<compile_context>
chip_gen: v7x
topology: tpu7x:2x2x1
jax: 0.10.0
libtpu: 0.0.40
codegen_flags: <defaults>
</compile_context>

<pallas_src>
import functools
import math

import jax
import jax.numpy as jnp
from jax.experimental import pallas as pl
from jax.experimental.pallas import tpu as pltpu


def drn_kernel(p_ref, t_ref, eb_ref, o_ref, *, in_features, out_bins):
    # p_ref : (TB, K*QL)   batch-major input tile, flattened features on lanes
    # t_ref : (K*N, K*QL)  block-diagonal T (batch-invariant, VMEM-resident)
    # eb_ref: (N, 1)       output-bin bias exponent (batch-invariant)
    # o_ref : (N, TB)      lane-dense output: batch on lanes, bins on sublanes
    K = in_features
    QU = out_bins
    N = t_ref.shape[0] // K                 # N = J * QU

    # Single MXU matmul (contraction on the minor dim of both operands):
    #   pw_all[k*N + n, t] = sum_m T[k, n, m] * P[t, k*QL + m]
    pw_all = jax.lax.dot_general(
        t_ref[...], p_ref[...],
        dimension_numbers=(((1,), (1,)), ((), ())),
        preferred_element_type=jnp.float32)             # (K*N, TB)

    # Lower clip only: with normalized P and bounded T the reference's upper
    # clamp at 1e15 is unreachable, so it would be a wasted VPU op.
    pw_all = jnp.maximum(pw_all, 1e-15)

    # log-sum over in_features with pairwise products: halves the EUP log
    # count; products stay far inside f32 range given the 1e-15 floor.
    terms = []
    k = 0
    while k + 1 < K:
        terms.append(jnp.log(pw_all[k * N:(k + 1) * N, :] *
                             pw_all[(k + 1) * N:(k + 2) * N, :]))
        k += 2
    if k < K:
        terms.append(jnp.log(pw_all[k * N:(k + 1) * N, :]))
    logsum = functools.reduce(lambda a, b: a + b, terms)          # (N, TB)
    logsum_b = logsum + eb_ref[...]                               # + (N, 1)

    # Per-output-feature softmax over its QU bins: each slice is an aligned
    # (QU, TB) sublane slab -> sublane max/sum, dense full-width stores.
    num_out_features = N // QU
    for j in range(num_out_features):
        lo = j * QU
        x = logsum_b[lo:lo + QU, :]                               # (QU, TB)
        mx = jnp.max(x, axis=0, keepdims=True)
        e = jnp.exp(x - mx)
        z = jnp.sum(e, axis=0, keepdims=True)
        o_ref[lo:lo + QU, :] = e * pl.reciprocal(z, approx=True)


def drn_precompute(W, ba, bq, lama, lamq, in_bins, out_bins):
    """Batch-invariant constants, computed once outside the kernel."""
    J, K = W.shape
    QL, QU = in_bins, out_bins
    N = J * QU

    m = jnp.arange(QL, dtype=jnp.float32) / QL
    l = jnp.arange(QU, dtype=jnp.float32) / QU
    log_d0 = -jnp.square(m[None, :] - l[:, None])                # (QU, QL)

    # T[j,k,l,m] = D0[l,m] ** W[j,k] = exp(W[j,k] * logD0[l,m])  (no pow/log)
    T = jnp.exp(W[:, :, None, None] * log_d0[None, None, :, :])  # (J,K,QU,QL)
    T_k = jnp.transpose(T, (1, 0, 2, 3)).reshape(K, N, QL)       # (K, N, QL)

    # Block-diagonal stacking over k so the kernel does ONE matmul:
    #   t_blk[k*N + n, c*QL + m] = T_k[k, n, m] if c == k else 0
    eye = jnp.eye(K, dtype=jnp.float32)
    t_blk = jnp.einsum('knm,kc->kncm', T_k, eye).reshape(K * N, K * QL)

    s = jnp.arange(QU, dtype=jnp.float32)[None, :] / QU          # (1, QU)
    exponent_b = (-bq * jnp.square(s - lamq)
                  - ba * jnp.abs(s - lama))                      # (J, QU)
    return t_blk, exponent_b.reshape(N, 1)


def drn_forward(P, t_blk, exponent_b, out_features, out_bins, *,
                batch_tile=256):
    B, K, QL = P.shape
    J, QU = out_features, out_bins
    N = J * QU
    KQL = K * QL
    assert t_blk.shape == (K * N, KQL)
    assert exponent_b.shape == (N, 1)

    # Lane-aligned batch tile (batch lives on the lane axis inside the kernel).
    if B >= 128:
        tb = max(128, (min(batch_tile, B) // 128) * 128)
    else:
        tb = B                      # single full-extent block is allowed
    b_pad = ((B + tb - 1) // tb) * tb

    # Natural batch-major layout: contiguous reshape, no standalone transpose
    # of P before the kernel (the producer-side relayout the review flagged).
    p_flat = P.reshape(B, KQL)
    if b_pad != B:
        # Padded rows give pw = 1e-15 floor -> finite softmax; sliced off below.
        p_flat = jnp.pad(p_flat, ((0, b_pad - B), (0, 0)))

    kernel = functools.partial(drn_kernel, in_features=K, out_bins=QU)

    out_nt = pl.pallas_call(
        kernel,
        out_shape=jax.ShapeDtypeStruct((N, b_pad), jnp.float32),
        grid=(b_pad // tb,),
        in_specs=[
            pl.BlockSpec((tb, KQL), lambda b: (b, 0)),      # P tile (per step)
            pl.BlockSpec((K * N, KQL), lambda b: (0, 0)),   # block-diagonal T
            pl.BlockSpec((N, 1), lambda b: (0, 0)),         # exponent_B
        ],
        out_specs=pl.BlockSpec((N, tb), lambda b: (0, b)),  # lane-dense output
        compiler_params=pltpu.CompilerParams(
            dimension_semantics=("parallel",)),
        cost_estimate=pl.CostEstimate(
            flops=int(2 * (K * N) * KQL * b_pad),
            transcendentals=int(b_pad * (N * ((K + 1) // 2 + 1) + J)),
            bytes_accessed=int(4 * (b_pad * KQL + K * N * KQL + N
                                    + N * b_pad)),
        ),
    )(p_flat, t_blk, exponent_b)

    # (N, B) -> (B, J, QU): cheap wrapper-side relayout of the small output.
    return out_nt[:, :B].T.reshape(B, J, QU)


def drn_reference(P, W, ba, bq, lama, lamq, in_bins, out_bins):
    """Pure-JAX transcription of the torch forward, for validation."""
    QL, QU = in_bins, out_bins
    m = jnp.arange(QL, dtype=jnp.float32) / QL
    l = jnp.arange(QU, dtype=jnp.float32) / QU
    D0 = jnp.exp(-jnp.square(m[None, :] - l[:, None]))           # (QU, QL)
    T = jnp.power(D0[None, None], W[:, :, None, None])           # (J, K, QU, QL)
    Pw = jnp.einsum('jklm,bkm->bjkl', T, P,
                    precision=jax.lax.Precision.HIGHEST)         # (B, J, K, QU)
    Pw = jnp.clip(Pw, 1e-15, 1e15)
    logsum = jnp.sum(jnp.log(Pw), axis=2)                        # (B, J, QU)
    s = jnp.arange(QU, dtype=jnp.float32)[None, :] / QU
    exponent_B = -bq * jnp.square(s - lamq) - ba * jnp.abs(s - lama)
    logsumB = logsum + exponent_B
    mx = jnp.max(logsumB, axis=2, keepdims=True)
    e = jnp.exp(logsumB - mx)
    return e / jnp.sum(e, axis=2, keepdims=True)


if __name__ == "__main__":
    B = 512                           # 2 grid steps of 256 -> both TCs busy
    in_features, in_bins = 4, 16      # K, QL
    out_features, out_bins = 4, 8     # J, QU

    key = jax.random.PRNGKey(0)
    kP, kW, kba, kbq, kla, klq = jax.random.split(key, 6)

    # Input distributions: positive, normalized over in_bins (like the paper).
    logits = jax.random.normal(kP, (B, in_features, in_bins), dtype=jnp.float32)
    P = jax.nn.softmax(logits, axis=-1)

    # Deterministic parameter init matching reset_parameters():
    # kaiming_uniform(a=sqrt(5)) on (J, K) -> uniform(-1/sqrt(K), 1/sqrt(K))
    bound = 1.0 / math.sqrt(in_features)
    W = jax.random.uniform(kW, (out_features, in_features), jnp.float32,
                           minval=-bound, maxval=bound)
    ba = jax.random.uniform(kba, (out_features, 1), jnp.float32,
                            minval=-bound, maxval=bound)
    bq = jax.random.uniform(kbq, (out_features, 1), jnp.float32,
                            minval=-bound, maxval=bound)
    lama = jax.random.uniform(kla, (out_features, 1), jnp.float32,
                              minval=0.0, maxval=1.0)
    lamq = jax.random.uniform(klq, (out_features, 1), jnp.float32,
                              minval=0.0, maxval=1.0)

    # Hoisted batch-invariant constants (computed once, outside the grid).
    t_blk, exponent_b = drn_precompute(W, ba, bq, lama, lamq, in_bins, out_bins)

    out = drn_forward(P, t_blk, exponent_b, out_features, out_bins,
                      batch_tile=256)
    out = jax.block_until_ready(out)

    ref = drn_reference(P, W, ba, bq, lama, lamq, in_bins, out_bins)
    assert out.shape == (B, out_features, out_bins)
    # Slightly looser tolerance than before to cover the approx reciprocal in
    # the softmax epilogue (relative error << 1e-3).
    assert jnp.allclose(out, ref, rtol=5e-3, atol=1e-4), "mismatch vs reference"

    print("KERNEL_OK")
</pallas_src>

<mosaic_0001>
module attributes {stable_mosaic.version = 11 : i64} {
  func.func @drn_kernel(%arg0: i32, %arg1: memref<256x64xf32, #tpu.memory_space<vmem>>, %arg2: memref<128x64xf32, #tpu.memory_space<vmem>>, %arg3: memref<32x1xf32, #tpu.memory_space<vmem>>, %arg4: memref<32x256xf32, #tpu.memory_space<vmem>>) attributes {dimension_semantics = [#tpu.dimension_semantics<parallel>], iteration_bounds = array<i64: 2>, scalar_prefetch = 0 : i64, scratch_operands = 0 : i64, tpu.core_type = #tpu.core_type<tc>, window_params = [{transform_indices = @transform_0, window_bounds = array<i64: 256, 64>}, {pipeline_mode = #tpu.pipeline_mode<synchronous>, transform_indices = @transform_1, window_bounds = array<i64: 128, 64>}, {pipeline_mode = #tpu.pipeline_mode<synchronous>, transform_indices = @transform_2, window_bounds = array<i64: 32, 1>}, {transform_indices = @transform_3, window_bounds = array<i64: 32, 256>}]} {
    %c0 = arith.constant 0 : index
    %c0_0 = arith.constant 0 : index
    %0 = vector.load %arg2[%c0, %c0_0] : memref<128x64xf32, #tpu.memory_space<vmem>>, vector<128x64xf32>
    %c0_1 = arith.constant 0 : index
    %c0_2 = arith.constant 0 : index
    %1 = vector.load %arg1[%c0_1, %c0_2] : memref<256x64xf32, #tpu.memory_space<vmem>>, vector<256x64xf32>
    %cst = arith.constant dense<0.000000e+00> : vector<128x256xf32>
    %2 = tpu.matmul %0, %1, %cst {dimension_numbers = #tpu.dot_dimension_numbers<[1], [1], [0], [0], [0, 0, 1, 0], [], []>} : vector<128x64xf32>, vector<256x64xf32>, vector<128x256xf32> -> vector<128x256xf32>
    %cst_3 = arith.constant 1.000000e-15 : f32
    %3 = vector.broadcast %cst_3 : f32 to vector<128x256xf32>
    %4 = arith.maximumf %2, %3 : vector<128x256xf32>
    %5 = vector.extract_strided_slice %4 {offsets = [0, 0], sizes = [32, 256], strides = [1, 1]} : vector<128x256xf32> to vector<32x256xf32>
    %6 = vector.extract_strided_slice %4 {offsets = [32, 0], sizes = [32, 256], strides = [1, 1]} : vector<128x256xf32> to vector<32x256xf32>
    %7 = arith.mulf %5, %6 : vector<32x256xf32>
    %8 = math.log %7 : vector<32x256xf32>
    %9 = vector.extract_strided_slice %4 {offsets = [64, 0], sizes = [32, 256], strides = [1, 1]} : vector<128x256xf32> to vector<32x256xf32>
    %10 = vector.extract_strided_slice %4 {offsets = [96, 0], sizes = [32, 256], strides = [1, 1]} : vector<128x256xf32> to vector<32x256xf32>
    %11 = arith.mulf %9, %10 : vector<32x256xf32>
    %12 = math.log %11 : vector<32x256xf32>
    %13 = arith.addf %8, %12 : vector<32x256xf32>
    %c0_4 = arith.constant 0 : index
    %c0_5 = arith.constant 0 : index
    %14 = vector.load %arg3[%c0_4, %c0_5] : memref<32x1xf32, #tpu.memory_space<vmem>>, vector<32x1xf32>
    %15 = vector.broadcast %14 : vector<32x1xf32> to vector<32x256xf32>
    %16 = arith.addf %13, %15 : vector<32x256xf32>
    %17 = vector.extract_strided_slice %16 {offsets = [0, 0], sizes = [8, 256], strides = [1, 1]} : vector<32x256xf32> to vector<8x256xf32>
    %cst_6 = arith.constant dense<0xFF800000> : vector<256xf32>
    %18 = vector.multi_reduction <maximumf>, %17, %cst_6 [0] : vector<8x256xf32> to vector<256xf32>
    %19 = vector.shape_cast %18 : vector<256xf32> to vector<1x256xf32>
    %20 = vector.broadcast %19 : vector<1x256xf32> to vector<8x256xf32>
    %21 = arith.subf %17, %20 : vector<8x256xf32>
    %22 = math.exp %21 : vector<8x256xf32>
    %cst_7 = arith.constant dense<0.000000e+00> : vector<256xf32>
    %23 = vector.multi_reduction <add>, %22, %cst_7 [0] : vector<8x256xf32> to vector<256xf32>
    %24 = vector.shape_cast %23 : vector<256xf32> to vector<1x256xf32>
    %25 = tpu.reciprocal %24 {approx = true} : vector<1x256xf32> -> vector<1x256xf32>
    %26 = vector.broadcast %25 : vector<1x256xf32> to vector<8x256xf32>
    %27 = arith.mulf %22, %26 : vector<8x256xf32>
    %c0_8 = arith.constant 0 : index
    %c0_9 = arith.constant 0 : index
    %28 = vector.load %arg4[%c0_8, %c0_9] : memref<32x256xf32, #tpu.memory_space<vmem>>, vector<8x256xf32>
    tpu.vector_store %arg4[%c0_8, %c0_9], %27 {strides = array<i32>} : memref<32x256xf32, #tpu.memory_space<vmem>>, vector<8x256xf32>,
    %29 = vector.extract_strided_slice %16 {offsets = [8, 0], sizes = [8, 256], strides = [1, 1]} : vector<32x256xf32> to vector<8x256xf32>
    %cst_10 = arith.constant dense<0xFF800000> : vector<256xf32>
    %30 = vector.multi_reduction <maximumf>, %29, %cst_10 [0] : vector<8x256xf32> to vector<256xf32>
    %31 = vector.shape_cast %30 : vector<256xf32> to vector<1x256xf32>
    %32 = vector.broadcast %31 : vector<1x256xf32> to vector<8x256xf32>
    %33 = arith.subf %29, %32 : vector<8x256xf32>
    %34 = math.exp %33 : vector<8x256xf32>
    %cst_11 = arith.constant dense<0.000000e+00> : vector<256xf32>
    %35 = vector.multi_reduction <add>, %34, %cst_11 [0] : vector<8x256xf32> to vector<256xf32>
    %36 = vector.shape_cast %35 : vector<256xf32> to vector<1x256xf32>
    %37 = tpu.reciprocal %36 {approx = true} : vector<1x256xf32> -> vector<1x256xf32>
    %38 = vector.broadcast %37 : vector<1x256xf32> to vector<8x256xf32>
    %39 = arith.mulf %34, %38 : vector<8x256xf32>
    %c8 = arith.constant 8 : index
    %c0_12 = arith.constant 0 : index
    %40 = vector.load %arg4[%c8, %c0_12] : memref<32x256xf32, #tpu.memory_space<vmem>>, vector<8x256xf32>
    tpu.vector_store %arg4[%c8, %c0_12], %39 {strides = array<i32>} : memref<32x256xf32, #tpu.memory_space<vmem>>, vector<8x256xf32>,
    %41 = vector.extract_strided_slice %16 {offsets = [16, 0], sizes = [8, 256], strides = [1, 1]} : vector<32x256xf32> to vector<8x256xf32>
    %cst_13 = arith.constant dense<0xFF800000> : vector<256xf32>
    %42 = vector.multi_reduction <maximumf>, %41, %cst_13 [0] : vector<8x256xf32> to vector<256xf32>
    %43 = vector.shape_cast %42 : vector<256xf32> to vector<1x256xf32>
    %44 = vector.broadcast %43 : vector<1x256xf32> to vector<8x256xf32>
    %45 = arith.subf %41, %44 : vector<8x256xf32>
    %46 = math.exp %45 : vector<8x256xf32>
    %cst_14 = arith.constant dense<0.000000e+00> : vector<256xf32>
    %47 = vector.multi_reduction <add>, %46, %cst_14 [0] : vector<8x256xf32> to vector<256xf32>
    %48 = vector.shape_cast %47 : vector<256xf32> to vector<1x256xf32>
    %49 = tpu.reciprocal %48 {approx = true} : vector<1x256xf32> -> vector<1x256xf32>
    %50 = vector.broadcast %49 : vector<1x256xf32> to vector<8x256xf32>
    %51 = arith.mulf %46, %50 : vector<8x256xf32>
    %c16 = arith.constant 16 : index
    %c0_15 = arith.constant 0 : index
    %52 = vector.load %arg4[%c16, %c0_15] : memref<32x256xf32, #tpu.memory_space<vmem>>, vector<8x256xf32>
    tpu.vector_store %arg4[%c16, %c0_15], %51 {strides = array<i32>} : memref<32x256xf32, #tpu.memory_space<vmem>>, vector<8x256xf32>,
    %53 = vector.extract_strided_slice %16 {offsets = [24, 0], sizes = [8, 256], strides = [1, 1]} : vector<32x256xf32> to vector<8x256xf32>
    %cst_16 = arith.constant dense<0xFF800000> : vector<256xf32>
    %54 = vector.multi_reduction <maximumf>, %53, %cst_16 [0] : vector<8x256xf32> to vector<256xf32>
    %55 = vector.shape_cast %54 : vector<256xf32> to vector<1x256xf32>
    %56 = vector.broadcast %55 : vector<1x256xf32> to vector<8x256xf32>
    %57 = arith.subf %53, %56 : vector<8x256xf32>
    %58 = math.exp %57 : vector<8x256xf32>
    %cst_17 = arith.constant dense<0.000000e+00> : vector<256xf32>
    %59 = vector.multi_reduction <add>, %58, %cst_17 [0] : vector<8x256xf32> to vector<256xf32>
    %60 = vector.shape_cast %59 : vector<256xf32> to vector<1x256xf32>
    %61 = tpu.reciprocal %60 {approx = true} : vector<1x256xf32> -> vector<1x256xf32>
    %62 = vector.broadcast %61 : vector<1x256xf32> to vector<8x256xf32>
    %63 = arith.mulf %58, %62 : vector<8x256xf32>
    %c24 = arith.constant 24 : index
    %c0_18 = arith.constant 0 : index
    %64 = vector.load %arg4[%c24, %c0_18] : memref<32x256xf32, #tpu.memory_space<vmem>>, vector<8x256xf32>
    tpu.vector_store %arg4[%c24, %c0_18], %63 {strides = array<i32>} : memref<32x256xf32, #tpu.memory_space<vmem>>, vector<8x256xf32>,
    return
  }
  func.func @transform_0(%arg0: i32) -> (i32, i32) {
    %c0_i32 = arith.constant 0 : i32
    %c0_i32_0 = arith.constant 0 : i32
    return %arg0, %c0_i32 : i32, i32
  }
  func.func @transform_1(%arg0: i32) -> (i32, i32) {
    %c0_i32 = arith.constant 0 : i32
    %c0_i32_0 = arith.constant 0 : i32
    %c0_i32_1 = arith.constant 0 : i32
    return %c0_i32, %c0_i32_0 : i32, i32
  }
  func.func @transform_2(%arg0: i32) -> (i32, i32) {
    %c0_i32 = arith.constant 0 : i32
    %c0_i32_0 = arith.constant 0 : i32
    %c0_i32_1 = arith.constant 0 : i32
    return %c0_i32, %c0_i32_0 : i32, i32
  }
  func.func @transform_3(%arg0: i32) -> (i32, i32) {
    %c0_i32 = arith.constant 0 : i32
    %c0_i32_0 = arith.constant 0 : i32
    return %c0_i32, %arg0 : i32, i32
  }
}

</mosaic_0001>

<bundles_post_ra>
// kernel: tpu_custom_call.1
= control target key start
LH: loop header
LB: loop body
LE: loop exit
PB: predicated region body
PF: predicated region fallthrough
CT: control target
= control target key end

     0   :  { %8 = vsyncpa [#allocation3], 0  ;;  %s1631_s0 = inlined_call_operand.vmem [shape: f32[512,64], index: 0, kind: input, shape index: {}]   ;;  %s1632_s1 = inlined_call_operand.vmem [shape: f32[128,64], index: 1, kind: input, shape index: {}]   ;;  %s1633_s2 = inlined_call_operand.vmem [shape: f32[32,1], index: 2, kind: input, shape index: {}]   ;;  %s1634_s3 = inlined_call_operand.hbm [shape: f32[32,512], index: 3, kind: output, shape index: {}]  }
   0x1   :  { %10 = vsyncpa [#allocation3 + $0x1], 0  ;;  %s1253_s12 = smov 0   ;;  %s1255_s13 = smov 0  }
   0x2   :  { %s1257_s14 = smov 0   ;;  %s1259_s15 = smov 0  }
   0x3 LB: > { %s1274_s16 = sadd.s32 4294967295, %s1226_s15   ;;  %s866_s17 = sadd.s32 4294967294, %s1226_s15   ;;  %s1226_s15 = sphi %s1259_s15, %s1642_s15   ;;  %s1222_s14 = sphi %s1257_s14, %s1641_s14   ;;  %s1218_s13 = sphi %s1255_s13, %s1640_s13   ;;  %s1214_s12 = sphi %s1253_s12, %s1639_s12  }
   0x4   : > { %s1278_s18 = sadd.s32 1, %s1226_s15   ;;  %s91_s19 = sadd.s32 1, %s1222_s14 }
   0x5   : > { %s88_s20 = ssub.s32 %s1226_s15, %s1278_s18  ;;  %p101_p0 = scmp.ne.s32.totalorder %s1222_s14, %s1218_s13 }
   0x6   : > { %p89_p1 = scmp.eq.s32.totalorder %s88_s20, 0  ;;  %p102_p2 = scmp.eq.s32.totalorder %s1274_s16, 1 }
   0x7   : > { %p107_p3 = scmp.ne.s32.totalorder %s1218_s13, %s1214_s12  ;;  %p108_p4 = scmp.eq.s32.totalorder %s866_s17, 1 }
   0x8   : > { %s1289_s21 = scalar_select %p89_p1, %s1222_s14, %s91_s19  }
   0x9   : > { %p1291_p5 = por %p102_p2, %p101_p0  ;;  %p1295_p6 = por %p108_p4, %p107_p3 }
   0xa   : > { %p869_p7 = scmp.ge.s32.totalorder %s1226_s15, 1  ;;  %p141_p8 = scmp.lt.s32.totalorder %s1226_s15, 3 }
   0xc   : > { %p142_p9 = pnand %p869_p7, %p141_p8 }
   0xd   : > { %s871_s24 = sshll.u32 (!%p142_p9), %s1274_s16, 5  ;;  %vm220_vm0 = vcmask (!%p142_p9), 523264   ;;  %v1305_v0 = vld [vmem:[%s1632_s1] sm:$0xff] (!%p142_p9)  ;;  %v1228_v2 = vmov (!%p142_p9), 0   ;;  %v616_v5 = vld [vmem:[%s1633_s2 + $0x10] sm:$0xff] (!%p142_p9)  ;;  %v615_v15 = vld [vmem:[%s1633_s2 + $0x8] sm:$0xff] (!%p142_p9) }
   0xe   : > { %145 = sbr.rel (%p142_p9) target bundleno = 424 (0x1a8), region = 32  ;;  %v1310_v1 = vld [vmem:[%s1632_s1 + $0x40] sm:$0xff] (!%p142_p9)  ;;  %p166_p10 = scmp.lt.s32.totalorder (!%p142_p9), %s871_s24, 63  ;;  %959 = vmatprep.mubr.msk.f32.mxu0 (!%p142_p9), %vm220_vm0, %v1305_v0  ;;  %1098 = vset.pattern.permute.xlu0 (!%p142_p9), %v1228_v2  ;;  %vm1326_vm1 = vmpackc.low (!%p142_p9), %vm220_vm0, %vm220_vm0  ;;  %v617_v16 = vld [vmem:[%s1633_s2 + $0x18] sm:$0xff] (!%p142_p9) }
   0xf   : > { %975 = vmatprep.mubr.msk.f32.mxu1 (!%p142_p9), %vm220_vm0, %v1310_v1  ;;  %1099 = vset.pattern.permute.xlu1 (!%p142_p9), %v1228_v2  ;;  %v614_v3 = vld [vmem:[%s1633_s2] sm:$0xff] (!%p142_p9)  ;;  %v173_v56 = vld [vmem:[%s1632_s1 + $0x8] sm:$0xff] (!%p142_p9)  ;;  %v174_v58 = vld [vmem:[%s1632_s1 + $0x10] sm:$0xff] (!%p142_p9)  ;;  %s162_s6 = sand.u32 (!%p142_p9), 1, %s1218_s13   ;;  %s926_s9 = sshll.u32 (!%p142_p9), %s1274_s16, 8 }
  0x10   : > { %620 = vperm.xlu0 (!%p142_p9), %1098, %v614_v3   ;;  %630 = vperm.xlu1 (!%p142_p9), %1099, %v616_v5   ;;  %v181_v57 = vld [vmem:[%s1632_s1 + $0x48] sm:$0xff] (!%p142_p9)  ;;  %v182_v59 = vld [vmem:[%s1632_s1 + $0x50] sm:$0xff] (!%p142_p9)  ;;  %v175_v60 = vld [vmem:[%s1632_s1 + $0x18] sm:$0xff] (!%p142_p9)  ;;  %s1584_s19 = scalar_lea.hbm (!%p142_p9), %s1634_s3, %s926_s9  ;;  %s1590_s16 = scalar_lea.sflag (!%p142_p9), [#allocation3], %s162_s6 }
  0x11   : > { %v183_v61 = vld [vmem:[%s1632_s1 + $0x58] sm:$0xff] (!%p142_p9)  ;;  %v176_v62 = vld [vmem:[%s1632_s1 + $0x20] sm:$0xff] (!%p142_p9)  ;;  %v178_v2 = vld [vmem:[%s1632_s1 + $0x30] sm:$0xff] (!%p142_p9) }
  0x12   : > { %v184_v63 = vld [vmem:[%s1632_s1 + $0x60] sm:$0xff] (!%p142_p9)  ;;  %v186_v3 = vld [vmem:[%s1632_s1 + $0x70] sm:$0xff] (!%p142_p9)  ;;  %v179_v4 = vld [vmem:[%s1632_s1 + $0x38] sm:$0xff] (!%p142_p9) }
  0x13   : > { %v187_v5 = vld [vmem:[%s1632_s1 + $0x78] sm:$0xff] (!%p142_p9) }
  0x14   : > { %625 = vperm.xlu0 (!%p142_p9), %1098, %v615_v15   ;;  %635 = vperm.xlu1 (!%p142_p9), %1099, %v617_v16  }
  0x15   : > { %s1644_s24 = smov (!%p166_p10, %s871_s24), 63 }
  0x16   : > { %s872_s29 = sshll.u32 %s1644_s24, 3  ;;  %s1229_s24 = smov [#allocation2]  }
  0x17   : > { %s1322_s7 = scalar_lea.vmem %s1631_s0, %s872_s29  ;;  %s1168_s25 = sshll.u32 %s1229_s24, 4  ;;  %s1169_s25 = int_to_ptr.vmem [resolvable:$false] %s1168_s25 }
  0x18   : > { %v204_v6 = vld [vmem:[%s1322_s7 + $0x80] sm:$0xff]  ;;  %v205_v7 = vld [vmem:[%s1322_s7 + $0x88] sm:$0xff]  ;;  %v206_v11 = vld [vmem:[%s1322_s7 + $0x90] sm:$0xff]  ;;  %s1170_s26 = scalar_lea.vmem %s1169_s25, 2048 }
  0x19   : > { %v188_v8 = vld [vmem:[%s1322_s7] sm:$0xff]  ;;  %v991_v9 = vpack.c.bf16 %v205_v7, %v204_v6  ;;  %v189_v10 = vld [vmem:[%s1322_s7 + $0x8] sm:$0xff]  ;;  %v207_v12 = vld [vmem:[%s1322_s7 + $0x98] sm:$0xff] }
  0x1a   : > { %v994_v13 = vpack.c.bf16 %v189_v10, %v188_v8  ;;  %v997_v14 = vpack.c.bf16 %v207_v12, %v206_v11  ;;  %v190_v17 = vld [vmem:[%s1322_s7 + $0x10] sm:$0xff]  ;;  %v191_v18 = vld [vmem:[%s1322_s7 + $0x18] sm:$0xff]  ;;  %v208_v19 = vld [vmem:[%s1322_s7 + $0xa0] sm:$0xff] }
  0x1b   : > { %993 = vmatprep.subr.msk.bf16.mxu0 %vm1326_vm1, %v991_v9  ;;  %1039 = vmatprep.subr.msk.bf16.mxu1 %vm1326_vm1, %v991_v9  ;;  %v209_v20 = vld [vmem:[%s1322_s7 + $0xa8] sm:$0xff]  ;;  %v1000_v21 = vpack.c.bf16 %v191_v18, %v190_v17  ;;  %v192_v23 = vld [vmem:[%s1322_s7 + $0x20] sm:$0xff]  ;;  %v210_v25 = vld [vmem:[%s1322_s7 + $0xb0] sm:$0xff] }
  0x1c   : > { %996 = vmatpush3.bf16.xpose.msk.msra.mxu0 %vm1326_vm1, %v994_v13  ;;  %1047 = vmatpush3.bf16.xpose.msk.msra.mxu1 %vm1326_vm1, %v994_v13  ;;  %v1003_v22 = vpack.c.bf16 %v209_v20, %v208_v19  ;;  %v193_v24 = vld [vmem:[%s1322_s7 + $0x28] sm:$0xff]  ;;  %v211_v26 = vld [vmem:[%s1322_s7 + $0xb8] sm:$0xff]  ;;  %v194_v29 = vld [vmem:[%s1322_s7 + $0x30] sm:$0xff] }
  0x1d   : > { %999 = vmatprep.subr.msk.bf16.mxu0 %vm1326_vm1, %v997_v14  ;;  %1040 = vmatprep.subr.msk.bf16.mxu1 %vm1326_vm1, %v997_v14  ;;  %v1006_v27 = vpack.c.bf16 %v193_v24, %v192_v23  ;;  %v1009_v28 = vpack.c.bf16 %v211_v26, %v210_v25  ;;  %v195_v30 = vld [vmem:[%s1322_s7 + $0x38] sm:$0xff]  ;;  %v212_v31 = vld [vmem:[%s1322_s7 + $0xc0] sm:$0xff]  ;;  %v213_v32 = vld [vmem:[%s1322_s7 + $0xc8] sm:$0xff] }
  0x1e   : > { %v1012_v33 = vpack.c.bf16 %v195_v30, %v194_v29  ;;  %v1015_v34 = vpack.c.bf16 %v213_v32, %v212_v31  ;;  %v196_v35 = vld [vmem:[%s1322_s7 + $0x40] sm:$0xff]  ;;  %v197_v36 = vld [vmem:[%s1322_s7 + $0x48] sm:$0xff]  ;;  %v214_v37 = vld [vmem:[%s1322_s7 + $0xd0] sm:$0xff] }
  0x1f   : > { %v215_v38 = vld [vmem:[%s1322_s7 + $0xd8] sm:$0xff]  ;;  %v1018_v39 = vpack.c.bf16 %v197_v36, %v196_v35  ;;  %v198_v41 = vld [vmem:[%s1322_s7 + $0x50] sm:$0xff]  ;;  %v216_v43 = vld [vmem:[%s1322_s7 + $0xe0] sm:$0xff] }
  0x20   : > { %v1021_v40 = vpack.c.bf16 %v215_v38, %v214_v37  ;;  %v199_v42 = vld [vmem:[%s1322_s7 + $0x58] sm:$0xff]  ;;  %v217_v44 = vld [vmem:[%s1322_s7 + $0xe8] sm:$0xff]  ;;  %v200_v47 = vld [vmem:[%s1322_s7 + $0x60] sm:$0xff] }
  0x21   : > { %v1024_v45 = vpack.c.bf16 %v199_v42, %v198_v41  ;;  %v1027_v46 = vpack.c.bf16 %v217_v44, %v216_v43  ;;  %v201_v48 = vld [vmem:[%s1322_s7 + $0x68] sm:$0xff]  ;;  %v218_v49 = vld [vmem:[%s1322_s7 + $0xf0] sm:$0xff]  ;;  %v219_v50 = vld [vmem:[%s1322_s7 + $0xf8] sm:$0xff] }
  0x22   : > { %v1030_v51 = vpack.c.bf16 %v201_v48, %v200_v47  ;;  %v1033_v52 = vpack.c.bf16 %v219_v50, %v218_v49  ;;  %v202_v53 = vld [vmem:[%s1322_s7 + $0x70] sm:$0xff]  ;;  %v203_v54 = vld [vmem:[%s1322_s7 + $0x78] sm:$0xff]  ;;  %s870_s7 = sshll.u32 %s162_s6, 6 }
  0x23   : > { %v1036_v55 = vpack.c.bf16 %v203_v54, %v202_v53  ;;  %s164_s8 = scalar_lea.vmem [#allocation2], %s870_s7 }
  0x24   : > { %1002 = vmatpush3.bf16.xpose.msk.msra.mxu0 %vm1326_vm1, %v1000_v21  ;;  %1048 = vmatpush3.bf16.xpose.msk.msra.mxu1 %vm1326_vm1, %v1000_v21  ;;  %s804_s10 = sshll.u32 %s164_s8, 4  ;;  %s1586_s10 = int_to_ptr.vmem [resolvable:$true] %s804_s10 }
  0x25   : > { %1005 = vmatprep.subr.msk.bf16.mxu0 %vm1326_vm1, %v1003_v22  ;;  %1041 = vmatprep.subr.msk.bf16.mxu1 %vm1326_vm1, %v1003_v22  ;;  %s1164_s20 = scalar_lea.vmem %s1586_s10, 1024  ;;  %p1171_p0 = scmp.lt.s32.totalorder %s1586_s10, %s1169_s25 }
  0x26   : > { %p1165_p11 = scmp.ne.s32.totalorder %s1586_s10, %s1164_s20  ;;  %p1172_p1 = scmp.lt.s32.totalorder %s1170_s26, %s1164_s20 }
  0x28   : > { %p1166_p12 = pnand %p1165_p11, %p1291_p5  ;;  %p1173_p2 = por %p1172_p1, %p1171_p0 }
  0x2a   : > { %p1167_p13 = pneg %p1166_p12 }
  0x2c   : > { %1008 = vmatpush3.bf16.xpose.msk.msra.mxu0 %vm1326_vm1, %v1006_v27  ;;  %1049 = vmatpush3.bf16.xpose.msk.msra.mxu1 %vm1326_vm1, %v1006_v27  ;;  %p1174_p3 = pnand %p1173_p2, %p1167_p13 }
  0x2d   : > { %1011 = vmatprep.subr.msk.bf16.mxu0 %vm1326_vm1, %v1009_v28  ;;  %1042 = vmatprep.subr.msk.bf16.mxu1 %vm1326_vm1, %v1009_v28 }
  0x34   : > { %1014 = vmatpush3.bf16.xpose.msk.msra.mxu0 %vm1326_vm1, %v1012_v33  ;;  %1050 = vmatpush3.bf16.xpose.msk.msra.mxu1 %vm1326_vm1, %v1012_v33 }
  0x35   : > { %1017 = vmatprep.subr.msk.bf16.mxu0 %vm1326_vm1, %v1015_v34  ;;  %1043 = vmatprep.subr.msk.bf16.mxu1 %vm1326_vm1, %v1015_v34 }
  0x3c   : > { %1020 = vmatpush3.bf16.xpose.msk.msra.mxu0 %vm1326_vm1, %v1018_v39  ;;  %1051 = vmatpush3.bf16.xpose.msk.msra.mxu1 %vm1326_vm1, %v1018_v39 }
  0x3d   : > { %1023 = vmatprep.subr.msk.bf16.mxu0 %vm1326_vm1, %v1021_v40  ;;  %1044 = vmatprep.subr.msk.bf16.mxu1 %vm1326_vm1, %v1021_v40 }
  0x44   : > { %1026 = vmatpush3.bf16.xpose.msk.msra.mxu0 %vm1326_vm1, %v1024_v45  ;;  %1052 = vmatpush3.bf16.xpose.msk.msra.mxu1 %vm1326_vm1, %v1024_v45 }
  0x45   : > { %1029 = vmatprep.subr.msk.bf16.mxu0 %vm1326_vm1, %v1027_v46  ;;  %1045 = vmatprep.subr.msk.bf16.mxu1 %vm1326_vm1, %v1027_v46 }
  0x4c   : > { %1032 = vmatpush3.bf16.xpose.msk.msra.mxu0 %vm1326_vm1, %v1030_v51  ;;  %1053 = vmatpush3.bf16.xpose.msk.msra.mxu1 %vm1326_vm1, %v1030_v51 }
  0x4d   : > { %1035 = vmatprep.subr.msk.bf16.mxu0 %vm1326_vm1, %v1033_v52  ;;  %1046 = vmatprep.subr.msk.bf16.mxu1 %vm1326_vm1, %v1033_v52 }
  0x54   : > { %1038 = vmatpush3.bf16.xpose.msk.msra.mxu0 %vm1326_vm1, %v1036_v55  ;;  %1054 = vmatpush3.bf16.xpose.msk.msra.mxu1 %vm1326_vm1, %v1036_v55 }
  0x5b   : > { %960 = vmatmul.mubr.msk.f32.vlgmr.msra.gmra.mrb[0].mxu0 %vm220_vm0, %v1305_v0  ;;  %976 = vmatmul.mubr.msk.f32.vlgmr.msra.gmra.mrb[0].mxu1 %vm220_vm0, %v1310_v1  ;;  %v177_v0 = vld [vmem:[%s1632_s1 + $0x28] sm:$0xff] }
  0x5c   : > { %961 = vmatprep.mubr.msk.f32.mxu0 %vm220_vm0, %v173_v56  ;;  %977 = vmatprep.mubr.msk.f32.mxu1 %vm220_vm0, %v181_v57  ;;  %v185_v1 = vld [vmem:[%s1632_s1 + $0x68] sm:$0xff] }
  0x5f   : > { %962 = vmatmul.mubr.msk.f32.gmra.mrb[2].mxu0 %vm220_vm0, %v173_v56  ;;  %978 = vmatmul.mubr.msk.f32.gmra.mrb[2].mxu1 %vm220_vm0, %v181_v57 }
  0x60   : > { %963 = vmatprep.mubr.msk.f32.mxu0 %vm220_vm0, %v174_v58  ;;  %979 = vmatprep.mubr.msk.f32.mxu1 %vm220_vm0, %v182_v59 }
  0x63   : > { %964 = vmatmul.mubr.msk.f32.gmra.mrb[4].mxu0 %vm220_vm0, %v174_v58  ;;  %980 = vmatmul.mubr.msk.f32.gmra.mrb[4].mxu1 %vm220_vm0, %v182_v59 }
  0x64   : > { %965 = vmatprep.mubr.msk.f32.mxu0 %vm220_vm0, %v175_v60  ;;  %981 = vmatprep.mubr.msk.f32.mxu1 %vm220_vm0, %v183_v61 }
  0x67   : > { %966 = vmatmul.mubr.msk.f32.gmra.mrb[6].mxu0 %vm220_vm0, %v175_v60  ;;  %982 = vmatmul.mubr.msk.f32.gmra.mrb[6].mxu1 %vm220_vm0, %v183_v61 }
  0x68   : > { %967 = vmatprep.mubr.msk.f32.mxu0 %vm220_vm0, %v176_v62  ;;  %983 = vmatprep.mubr.msk.f32.mxu1 %vm220_vm0, %v184_v63 }
  0x6b   : > { %968 = vmatmul.mubr.msk.f32.gmra.mrb[8].mxu0 %vm220_vm0, %v176_v62  ;;  %984 = vmatmul.mubr.msk.f32.gmra.mrb[8].mxu1 %vm220_vm0, %v184_v63 }
  0x6c   : > { %969 = vmatprep.mubr.msk.f32.mxu0 %vm220_vm0, %v177_v0  ;;  %985 = vmatprep.mubr.msk.f32.mxu1 %vm220_vm0, %v185_v1 }
  0x6f   : > { %970 = vmatmul.mubr.msk.f32.gmra.mrb[10].mxu0 %vm220_vm0, %v177_v0  ;;  %986 = vmatmul.mubr.msk.f32.gmra.mrb[10].mxu1 %vm220_vm0, %v185_v1 }
  0x70   : > { %971 = vmatprep.mubr.msk.f32.mxu0 %vm220_vm0, %v178_v2  ;;  %987 = vmatprep.mubr.msk.f32.mxu1 %vm220_vm0, %v186_v3 }
  0x73   : > { %972 = vmatmul.mubr.msk.f32.gmra.mrb[12].mxu0 %vm220_vm0, %v178_v2  ;;  %988 = vmatmul.mubr.msk.f32.gmra.mrb[12].mxu1 %vm220_vm0, %v186_v3 }
  0x74   : > { %973 = vmatprep.mubr.msk.f32.mxu0 %vm220_vm0, %v179_v4  ;;  %989 = vmatprep.mubr.msk.f32.mxu1 %vm220_vm0, %v187_v5 }
  0x77   : > { %974 = vmatmul.mubr.msk.f32.gmra.mrb[14].mxu0 %vm220_vm0, %v179_v4  ;;  %990 = vmatmul.mubr.msk.f32.gmra.mrb[14].mxu1 %vm220_vm0, %v187_v5 }
 0x12e   : > { %v431_v6 = vpop.f32.mrb[0].mxu0  ;;  %v479_v7 = vpop.f32.mrb[0].mxu1 }
 0x12f   : > { %v433_v8 = vpop.f32.mrb[1].mxu0  ;;  %v481_v9 = vpop.f32.mrb[1].mxu1  ;;  %v526_v22 = vmax.f32 %v431_v6, 1e-15  ;;  %v542_v23 = vmax.f32 %v479_v7, 1e-15 }
 0x130   : > { %v527_v24 = vmax.f32 %v433_v8, 1e-15  ;;  %v543_v25 = vmax.f32 %v481_v9, 1e-15 }
 0x132   : > { %v437_v10 = vpop.f32.mrb[2].mxu0  ;;  %v485_v11 = vpop.f32.mrb[2].mxu1 }
 0x133   : > { %v439_v12 = vpop.f32.mrb[3].mxu0  ;;  %v487_v13 = vpop.f32.mrb[3].mxu1  ;;  %v528_v32 = vmax.f32 %v437_v10, 1e-15  ;;  %v544_v35 = vmax.f32 %v485_v11, 1e-15 }
 0x134   : > { %v529_v36 = vmax.f32 %v439_v12, 1e-15  ;;  %v545_v39 = vmax.f32 %v487_v13, 1e-15 }
 0x136   : > { %v443_v14 = vpop.f32.mrb[4].mxu0  ;;  %v491_v15 = vpop.f32.mrb[4].mxu1 }
 0x137   : > { %v1509_v16 = vpop.f32.mrb[5].mxu0  ;;  %v1511_v17 = vpop.f32.mrb[5].mxu1  ;;  %v530_v40 = vmax.f32 %v443_v14, 1e-15  ;;  %v546_v49 = vmax.f32 %v491_v15, 1e-15 }
 0x138   : > { %v531_v52 = vmax.f32 %v1509_v16, 1e-15  ;;  %v547_v55 = vmax.f32 %v1511_v17, 1e-15 }
 0x13a   : > { %v1513_v18 = vpop.f32.mrb[6].mxu0  ;;  %v1515_v19 = vpop.f32.mrb[6].mxu1 }
 0x13b   : > { %v1517_v20 = vpop.f32.mrb[7].mxu0  ;;  %v1519_v21 = vpop.f32.mrb[7].mxu1  ;;  %v532_v0 = vmax.f32 %v1513_v18, 1e-15  ;;  %v548_v3 = vmax.f32 %v1515_v19, 1e-15 }
 0x13c   : > { %v533_v6 = vmax.f32 %v1517_v20, 1e-15  ;;  %v549_v15 = vmax.f32 %v1519_v21, 1e-15 }
 0x13e   : > { %v455_v26 = vpop.f32.mrb[8].mxu0  ;;  %v503_v27 = vpop.f32.mrb[8].mxu1 }
 0x13f   : > { %v534_v28 = vmax.f32 %v455_v26, 1e-15  ;;  %v550_v29 = vmax.f32 %v503_v27, 1e-15  ;;  %v457_v30 = vpop.f32.mrb[9].mxu0  ;;  %v505_v31 = vpop.f32.mrb[9].mxu1 }
 0x140   : > { %v535_v33 = vmax.f32 %v457_v30, 1e-15  ;;  %v551_v34 = vmax.f32 %v505_v31, 1e-15 }
 0x141   : > { %v558_v37 = vmul.f32 %v534_v28, %v526_v22  ;;  %v582_v38 = vmul.f32 %v550_v29, %v542_v23 }
 0x142   : > { %v559_v41 = vmul.f32 %v535_v33, %v527_v24  ;;  %v583_v42 = vmul.f32 %v551_v34, %v543_v25  ;;  %v461_v43 = vpop.f32.mrb[10].mxu0  ;;  %v509_v44 = vpop.f32.mrb[10].mxu1 }
 0x143   : > { %1100 = vlog2.f32 %v558_v37  ;;  %v536_v45 = vmax.f32 %v461_v43, 1e-15  ;;  %v552_v46 = vmax.f32 %v509_v44, 1e-15  ;;  %v463_v47 = vpop.f32.mrb[11].mxu0  ;;  %v511_v48 = vpop.f32.mrb[11].mxu1 }
 0x144   : > { %1102 = vlog2.f32 %v582_v38  ;;  %v537_v50 = vmax.f32 %v463_v47, 1e-15  ;;  %v553_v51 = vmax.f32 %v511_v48, 1e-15  ;;  %v621_v25 = vpop.permute.xlu0 %620 }
 0x145   : > { %1104 = vlog2.f32 %v559_v41  ;;  %v560_v53 = vmul.f32 %v536_v45, %v528_v32  ;;  %v584_v54 = vmul.f32 %v552_v46, %v544_v35 }
 0x146   : > { %1106 = vlog2.f32 %v583_v42  ;;  %v561_v56 = vmul.f32 %v537_v50, %v529_v36  ;;  %v585_v57 = vmul.f32 %v553_v51, %v545_v39  ;;  %v467_v58 = vpop.f32.mrb[12].mxu0  ;;  %v515_v59 = vpop.f32.mrb[12].mxu1 }
 0x147   : > { %1108 = vlog2.f32 %v560_v53  ;;  %v538_v60 = vmax.f32 %v467_v58, 1e-15  ;;  %v554_v61 = vmax.f32 %v515_v59, 1e-15  ;;  %v469_v62 = vpop.f32.mrb[13].mxu0  ;;  %v517_v63 = vpop.f32.mrb[13].mxu1 }
 0x148   : > { %1110 = vlog2.f32 %v584_v54  ;;  %v539_v1 = vmax.f32 %v469_v62, 1e-15  ;;  %v555_v2 = vmax.f32 %v517_v63, 1e-15  ;;  %v631_v62 = vpop.permute.xlu1 %630 }
 0x149   : > { %1112 = vlog2.f32 %v561_v56  ;;  %v562_v4 = vmul.f32 %v538_v60, %v530_v40  ;;  %v586_v5 = vmul.f32 %v554_v61, %v546_v49  ;;  %v626_v40 = vpop.permute.xlu0 %625 }
 0x14a   : > { %1114 = vlog2.f32 %v585_v57  ;;  %v563_v7 = vmul.f32 %v539_v1, %v531_v52  ;;  %v587_v8 = vmul.f32 %v555_v2, %v547_v55  ;;  %v473_v9 = vpop.f32.mrb[14].mxu0  ;;  %v521_v10 = vpop.f32.mrb[14].mxu1 }
 0x14b   : > { %1116 = vlog2.f32 %v562_v4  ;;  %v540_v11 = vmax.f32 %v473_v9, 1e-15  ;;  %v556_v12 = vmax.f32 %v521_v10, 1e-15  ;;  %v475_v13 = vpop.f32.mrb[15].mxu0  ;;  %v523_v14 = vpop.f32.mrb[15].mxu1 }
 0x14c   : > { %1118 = vlog2.f32 %v586_v5  ;;  %v541_v16 = vmax.f32 %v475_v13, 1e-15  ;;  %v557_v17 = vmax.f32 %v523_v14, 1e-15 }
 0x14d   : > { %v1101_v18 = vpop.eup %1100  ;;  %1120 = vlog2.f32 %v563_v7  ;;  %v564_v19 = vmul.f32 %v540_v11, %v532_v0  ;;  %v588_v22 = vmul.f32 %v556_v12, %v548_v3 }
 0x14e   : > { %v1103_v20 = vpop.eup %1102  ;;  %1122 = vlog2.f32 %v587_v8  ;;  %v565_v23 = vmul.f32 %v541_v16, %v533_v6  ;;  %v589_v24 = vmul.f32 %v557_v17, %v549_v15  ;;  %v567_v26 = vmul.f32 0.6931472, %v1101_v18 }
 0x14f   : > { %v1105_v27 = vpop.eup %1104  ;;  %1124 = vlog2.f32 %v564_v19  ;;  %v591_v28 = vmul.f32 0.6931472, %v1103_v20 }
 0x150   : > { %v1107_v29 = vpop.eup %1106  ;;  %1126 = vlog2.f32 %v588_v22  ;;  %v569_v30 = vmul.f32 0.6931472, %v1105_v27 }
 0x151   : > { %v1109_v21 = vpop.eup %1108  ;;  %1128 = vlog2.f32 %v565_v23  ;;  %v593_v31 = vmul.f32 0.6931472, %v1107_v29  ;;  %v606_v32 = vadd.f32 %v591_v28, %v567_v26  ;;  %v636_v26 = vpop.permute.xlu1 %635 }
 0x152   : > { %v1111_v33 = vpop.eup %1110  ;;  %1130 = vlog2.f32 %v589_v24  ;;  %v571_v34 = vmul.f32 0.6931472, %v1109_v21 }
 0x153   : > { %v1113_v35 = vpop.eup %1112  ;;  %v607_v36 = vadd.f32 %v593_v31, %v569_v30  ;;  %v1527_v37 = vadd.f32 %v621_v25, %v606_v32  ;;  %v595_v38 = vmul.f32 0.6931472, %v1111_v33 }
 0x154   : > { %v1115_v39 = vpop.eup %1114  ;;  %v573_v41 = vmul.f32 0.6931472, %v1113_v35 }
 0x155   : > { %v1117_v42 = vpop.eup %1116  ;;  %v1529_v43 = vadd.f32 %v621_v25, %v607_v36  ;;  %v646_v44 = vrot.slane %v1527_v37, 4  ;;  %v597_v45 = vmul.f32 0.6931472, %v1115_v39  ;;  %v608_v46 = vadd.f32 %v595_v38, %v571_v34 }
 0x156   : > { %v1119_v47 = vpop.eup %1118  ;;  %v575_v48 = vmul.f32 0.6931472, %v1117_v42 }
 0x157   : > { %v1121_v49 = vpop.eup %1120  ;;  %v647_v50 = vmax.f32 %v1527_v37, %v646_v44  ;;  %v652_v51 = vrot.slane %v1529_v43, 4  ;;  %v609_v52 = vadd.f32 %v597_v45, %v573_v41  ;;  %v1534_v53 = vadd.f32 %v626_v40, %v608_v46 }
 0x158   : > { %v1123_v54 = vpop.eup %1122  ;;  %v577_v55 = vmul.f32 0.6931472, %v1121_v49  ;;  %v599_v56 = vmul.f32 0.6931472, %v1119_v47 }
 0x159   : > { %v1125_v57 = vpop.eup %1124  ;;  %v648_v58 = vrot.slane %v647_v50, 2  ;;  %v653_v59 = vmax.f32 %v1529_v43, %v652_v51  ;;  %v1537_v60 = vadd.f32 %v626_v40, %v609_v52  ;;  %v682_v61 = vrot.slane %v1534_v53, 4 }
 0x15a   : > { %v1127_v63 = vpop.eup %1126  ;;  %v601_v0 = vmul.f32 0.6931472, %v1123_v54  ;;  %v610_v1 = vadd.f32 %v599_v56, %v575_v48  ;;  %v579_v2 = vmul.f32 0.6931472, %v1125_v57 }
 0x15b   : > { %v1129_v3 = vpop.eup %1128  ;;  %v649_v4 = vmax.f32 %v647_v50, %v648_v58  ;;  %v654_v5 = vrot.slane %v653_v59, 2  ;;  %v683_v6 = vmax.f32 %v1534_v53, %v682_v61  ;;  %v688_v7 = vrot.slane %v1537_v60, 4 }
 0x15c   : > { %v1131_v8 = vpop.eup %1130  ;;  %v611_v9 = vadd.f32 %v601_v0, %v577_v55  ;;  %v642_v10 = vadd.f32 %v631_v62, %v610_v1  ;;  %v581_v11 = vmul.f32 0.6931472, %v1129_v3  ;;  %v603_v12 = vmul.f32 0.6931472, %v1127_v63 }
 0x15d   : > { %v650_v13 = vrot.slane %v649_v4, 1  ;;  %v655_v14 = vmax.f32 %v653_v59, %v654_v5  ;;  %v684_v15 = vrot.slane %v683_v6, 2  ;;  %v689_v16 = vmax.f32 %v1537_v60, %v688_v7 }
 0x15e   : > { %v643_v17 = vadd.f32 %v631_v62, %v611_v9  ;;  %v718_v18 = vrot.slane %v642_v10, 4  ;;  %v605_v19 = vmul.f32 0.6931472, %v1131_v8  ;;  %v612_v22 = vadd.f32 %v603_v12, %v579_v2 }
 0x15f   : > { %v651_v20 = vmax.f32 %v649_v4, %v650_v13  ;;  %v656_v23 = vrot.slane %v655_v14, 1  ;;  %v685_v24 = vmax.f32 %v683_v6, %v684_v15  ;;  %v690_v25 = vrot.slane %v689_v16, 2 }
 0x160   : > { %v719_v27 = vmax.f32 %v642_v10, %v718_v18  ;;  %v724_v28 = vrot.slane %v643_v17, 4  ;;  %v613_v29 = vadd.f32 %v605_v19, %v581_v11  ;;  %v644_v30 = vadd.f32 %v636_v26, %v612_v22 }
 0x161   : > { %v657_v21 = vmax.f32 %v655_v14, %v656_v23  ;;  %v658_v31 = vsub.f32 %v1527_v37, %v651_v20  ;;  %v686_v32 = vrot.slane %v685_v24, 1  ;;  %v691_v33 = vmax.f32 %v689_v16, %v690_v25 }
 0x162   : > { %v720_v34 = vrot.slane %v719_v27, 2  ;;  %v725_v35 = vmax.f32 %v643_v17, %v724_v28  ;;  %v645_v36 = vadd.f32 %v636_v26, %v613_v29  ;;  %v754_v38 = vrot.slane %v644_v30, 4 }
 0x163   : > { %v659_v39 = vsub.f32 %v1529_v43, %v657_v21  ;;  %v660_v40 = vmul.f32 1.442695, %v658_v31  ;;  %v687_v41 = vmax.f32 %v685_v24, %v686_v32  ;;  %v692_v42 = vrot.slane %v691_v33, 1 }
 0x164   : > { %v721_v44 = vmax.f32 %v719_v27, %v720_v34  ;;  %v726_v45 = vrot.slane %v725_v35, 2  ;;  %v755_v46 = vmax.f32 %v644_v30, %v754_v38  ;;  %v760_v47 = vrot.slane %v645_v36, 4 }
 0x165   : > { %1132 = vpow2.f32 %v660_v40  ;;  %v662_v48 = vmul.f32 1.442695, %v659_v39  ;;  %v693_v49 = vmax.f32 %v691_v33, %v692_v42  ;;  %v694_v37 = vsub.f32 %v1534_v53, %v687_v41 }
 0x166   : > { %v722_v50 = vrot.slane %v721_v44, 1  ;;  %v727_v51 = vmax.f32 %v725_v35, %v726_v45  ;;  %v756_v52 = vrot.slane %v755_v46, 2  ;;  %v761_v54 = vmax.f32 %v645_v36, %v760_v47 }
 0x167   : > { %1134 = vpow2.f32 %v662_v48  ;;  %v695_v55 = vsub.f32 %v1537_v60, %v693_v49  ;;  %v696_v43 = vmul.f32 1.442695, %v694_v37 }
 0x168   : > { %v723_v56 = vmax.f32 %v721_v44, %v722_v50  ;;  %v728_v57 = vrot.slane %v727_v51, 1  ;;  %v757_v58 = vmax.f32 %v755_v46, %v756_v52  ;;  %v762_v59 = vrot.slane %v761_v54, 2 }
 0x169   : > { %1136 = vpow2.f32 %v696_v43  ;;  %v698_v61 = vmul.f32 1.442695, %v695_v55 }
 0x16a   : > { %v729_v62 = vmax.f32 %v727_v51, %v728_v57  ;;  %v730_v63 = vsub.f32 %v642_v10, %v723_v56  ;;  %v758_v0 = vrot.slane %v757_v58, 1  ;;  %v763_v1 = vmax.f32 %v761_v54, %v762_v59 }
 0x16b   : > { %1138 = vpow2.f32 %v698_v61 }
 0x16c   : > { %v731_v53 = vsub.f32 %v643_v17, %v729_v62  ;;  %v732_v2 = vmul.f32 1.442695, %v730_v63  ;;  %v759_v3 = vmax.f32 %v757_v58, %v758_v0  ;;  %v764_v4 = vrot.slane %v763_v1, 1 }
 0x16e   : > { %1140 = vpow2.f32 %v732_v2  ;;  %v734_v5 = vmul.f32 1.442695, %v731_v53  ;;  %v765_v6 = vmax.f32 %v763_v1, %v764_v4  ;;  %v766_v60 = vsub.f32 %v644_v30, %v759_v3 }
 0x16f   : > { %v1547_v7 = vpop.eup %1132 }
 0x170   : > { %v664_v8 = vrot.slane %v1547_v7, 4  ;;  %1142 = vpow2.f32 %v734_v5  ;;  %v767_v9 = vsub.f32 %v645_v36, %v765_v6  ;;  %v768_v11 = vmul.f32 1.442695, %v766_v60 }
 0x171   : > { %v1550_v12 = vpop.eup %1134 }
 0x172   : > { %v665_v10 = vadd.f32 %v1547_v7, %v664_v8  ;;  %v670_v13 = vrot.slane %v1550_v12, 4  ;;  %1144 = vpow2.f32 %v768_v11  ;;  %v770_v14 = vmul.f32 1.442695, %v767_v9 }
 0x173   : > { %v1554_v15 = vpop.eup %1136 }
 0x174   : > { %v666_v16 = vrot.slane %v665_v10, 2  ;;  %v671_v17 = vadd.f32 %v1550_v12, %v670_v13  ;;  %v700_v18 = vrot.slane %v1554_v15, 4  ;;  %1146 = vpow2.f32 %v770_v14 }
 0x175   : > { %v1558_v19 = vpop.eup %1138 }
 0x176   : > { %v667_v22 = vadd.f32 %v666_v16, %v665_v10  ;;  %v672_v20 = vrot.slane %v671_v17, 2  ;;  %v701_v23 = vadd.f32 %v1554_v15, %v700_v18  ;;  %v706_v24 = vrot.slane %v1558_v19, 4 }
 0x178   : > { %v1562_v25 = vpop.eup %1140  ;;  %v668_v26 = vrot.slane %v667_v22, 1  ;;  %v673_v27 = vadd.f32 %v672_v20, %v671_v17  ;;  %v702_v28 = vrot.slane %v701_v23, 2  ;;  %v707_v29 = vadd.f32 %v1558_v19, %v706_v24 }
 0x179   : > { %v736_v30 = vrot.slane %v1562_v25, 4 }
 0x17a   : > { %v1566_v21 = vpop.eup %1142  ;;  %v669_v31 = vadd.f32 %v668_v26, %v667_v22  ;;  %v674_v32 = vrot.slane %v673_v27, 1  ;;  %v703_v33 = vadd.f32 %v702_v28, %v701_v23  ;;  %v708_v34 = vrot.slane %v707_v29, 2 }
 0x17b   : > { %v737_v35 = vadd.f32 %v1562_v25, %v736_v30  ;;  %v742_v36 = vrot.slane %v1566_v21, 4 }
 0x17c   : > { %v1145_v38 = vpop.eup %1144  ;;  %v675_v39 = vadd.f32 %v674_v32, %v673_v27  ;;  %1148 = vrcp.f32 %v669_v31  ;;  %v704_v40 = vrot.slane %v703_v33, 1  ;;  %v709_v41 = vadd.f32 %v708_v34, %v707_v29 }
 0x17d   : > { %v738_v42 = vrot.slane %v737_v35, 2  ;;  %v743_v44 = vadd.f32 %v1566_v21, %v742_v36  ;;  %v772_v45 = vrot.slane %v1145_v38, 4 }
 0x17e   : > { %v1147_v46 = vpop.eup %1146  ;;  %1150 = vrcp.f32 %v675_v39  ;;  %v705_v47 = vadd.f32 %v704_v40, %v703_v33  ;;  %v710_v48 = vrot.slane %v709_v41, 1 }
 0x17f   : > { %v739_v49 = vadd.f32 %v738_v42, %v737_v35  ;;  %v744_v37 = vrot.slane %v743_v44, 2  ;;  %v773_v50 = vadd.f32 %v1145_v38, %v772_v45  ;;  %v778_v51 = vrot.slane %v1147_v46, 4 }
 0x180   : > { %v711_v52 = vadd.f32 %v710_v48, %v709_v41  ;;  %1152 = vrcp.f32 %v705_v47 }
 0x181   : > { %v740_v54 = vrot.slane %v739_v49, 1  ;;  %v745_v55 = vadd.f32 %v744_v37, %v743_v44  ;;  %v774_v43 = vrot.slane %v773_v50, 2  ;;  %v779_v56 = vadd.f32 %v1147_v46, %v778_v51 }
 0x182   : > { %1154 = vrcp.f32 %v711_v52 }
 0x183   : > { %v741_v57 = vadd.f32 %v740_v54, %v739_v49  ;;  %v746_v58 = vrot.slane %v745_v55, 1  ;;  %v775_v59 = vadd.f32 %v774_v43, %v773_v50  ;;  %v780_v61 = vrot.slane %v779_v56, 2 }
 0x185   : > { %v747_v62 = vadd.f32 %v746_v58, %v745_v55  ;;  %1156 = vrcp.f32 %v741_v57  ;;  %v776_v63 = vrot.slane %v775_v59, 1  ;;  %v781_v0 = vadd.f32 %v780_v61, %v779_v56 }
 0x186   : > { %v1149_v1 = vpop.eup %1148 }
 0x187   : > { %v678_v53 = vmul.f32 %v1149_v1, %v1547_v7  ;;  %1158 = vrcp.f32 %v747_v62  ;;  %v777_v2 = vadd.f32 %v776_v63, %v775_v59  ;;  %v782_v3 = vrot.slane %v781_v0, 1 }
 0x188   : > { %v1151_v4 = vpop.eup %1150 }
 0x189   : > { %v679_v5 = vmul.f32 %v1151_v4, %v1550_v12  ;;  %680 = vst [vmem:[%s164_s8] sm:$0xff] %v678_v53  ;;  %v783_v6 = vadd.f32 %v782_v3, %v781_v0  ;;  %1160 = vrcp.f32 %v777_v2 }
 0x18a   : > { %v1153_v60 = vpop.eup %1152 }
 0x18b   : > { %681 = vst [vmem:[%s164_s8 + $0x8] sm:$0xff] %v679_v5  ;;  %v714_v8 = vmul.f32 %v1153_v60, %v1554_v15  ;;  %1162 = vrcp.f32 %v783_v6 }
 0x18c   : > { %v1155_v9 = vpop.eup %1154 }
 0x18d   : > { %v715_v11 = vmul.f32 %v1155_v9, %v1558_v19  ;;  %716 = vst [vmem:[%s164_s8 + $0x10] sm:$0xff] %v714_v8 }
 0x18f   : > { %v1157_v7 = vpop.eup %1156  ;;  %717 = vst [vmem:[%s164_s8 + $0x18] sm:$0xff] %v715_v11 }
 0x190   : > { %v750_v10 = vmul.f32 %v1157_v7, %v1562_v25 }
 0x191   : > { %v1159_v12 = vpop.eup %1158 }
 0x192   : > { %v751_v13 = vmul.f32 %v1159_v12, %v1566_v21  ;;  %752 = vst [vmem:[%s164_s8 + $0x20] sm:$0xff] %v750_v10 }
 0x193   : > { %v1161_v14 = vpop.eup %1160 }
 0x194   : > { %753 = vst [vmem:[%s164_s8 + $0x28] sm:$0xff] %v751_v13  ;;  %v786_v15 = vmul.f32 %v1161_v14, %v1145_v38 }
 0x195   : > { %v1163_v16 = vpop.eup %1162 }
 0x196   : > { %v787_v17 = vmul.f32 %v1163_v16, %v1147_v46  ;;  %788 = vst [vmem:[%s164_s8 + $0x30] sm:$0xff] %v786_v15 }
 0x198   : > { %789 = vst [vmem:[%s164_s8 + $0x38] sm:$0xff] %v787_v17 }
 0x199   : > { %1177 = shalt.err (!%p1174_p3)
}
 0x19a   : > { %s1178_s27 = scalar_lea.hbm %s1584_s19, 1024  ;;  %s1182_s30 = scalar_lea.hbm %s1634_s3, 2048 }
 0x19b   : > { %p1179_p4 = scmp.ne.s32.totalorder %s1584_s19, %s1178_s27  ;;  %p1183_p9 = scmp.lt.u32.totalorder %s1584_s19, %s1634_s3 }
 0x19c   : > { %p1184_p10 = scmp.lt.u32.totalorder %s1182_s30, %s1178_s27  ;;  %p1186_p12 = scmp.lt.u32.totalorder %s1178_s27, %s1584_s19 }
 0x19d   : > { %p1180_p7 = pnand %p1179_p4, %p1291_p5 }
 0x19e   : > { %p1185_p11 = por %p1184_p10, %p1183_p9 }
 0x19f   : > { %p1181_p8 = pneg %p1180_p7 }
 0x1a0   : > { %p1187_p13 = por %p1186_p12, %p1185_p11 }
 0x1a2   : > { %p1188_p0 = pnand %p1187_p13, %p1181_p8 }
 0x1a4   : > { %1191 = shalt.err (!%p1188_p0)
}
 0x1a5   : > { %s1230_s6 = smov 256   ;;  %s1231_s7 = smov 512  }
 0x1a6   : > { %s1232_s8 = smov 16  }
 0x1a7   : > { %1055 = dma.vmem_to_hbm [thread:$0]  (%p1291_p5), %s1586_s10, 1024, %s1584_s19, %s1590_s16, %s1230_s6, %s1231_s7, %s1232_s8  }
 0x1a8 PF: > { %p1061_p1 = scmp.ge.s32.totalorder %s1226_s15, 2  ;;  %s819_s9 = sand.u32 1, %s1214_s12  }
 0x1a9   : > { %s820_s11 = scalar_lea.sflag [#allocation3], %s819_s9 }
 0x1aa   : > { %p1058_p2 = pnand %p1061_p1, %p1295_p6 }
 0x1ac   : > { %1209 = dma.done.wait (!%p1058_p2), %s820_s11, 1024  }
 0x1ad   : > { %1211 = vsyncadd (!%p1058_p2), %s820_s11, 4294966272  ;;  %p13_p3 = scmp.ge.s32.totalorder %s1278_s18, 4   ;;  %s1639_s12 = smov %s1218_s13 }
 0x1ae   : > { %s1640_s13 = smov %s1222_s14  ;;  %s1641_s14 = smov %s1289_s21 }
 0x1af   : > { %s1642_s15 = smov %s1278_s18  ;;  %15 = sbr.rel (!%p13_p3) target bundleno = 3 (0x3), region = 67 }
 0x1b6   :  { %825 = vsyncpa [#allocation3], 1 }
 0x1b7   :  { %827 = vsyncpa [#allocation3 + $0x1], 1 }

</bundles_post_ra>
